<compile_context>
chip_gen: v7x
topology: tpu7x:2x2x1
jax: 0.10.0
libtpu: 0.0.40
codegen_flags: <defaults>
</compile_context>

<pallas_src>
import jax
import jax.numpy as jnp
import numpy as np
from jax import lax
from jax.experimental import pallas as pl
from jax.experimental.pallas import tpu as pltpu

K = 3    # kernel size
S = 2    # stride
P = 1    # padding
OP = 1   # output_padding

# Per-axis tap selection for the phase decomposition:
#   _SEL[d, s, k] == 1 iff output phase d (0 = even, 1 = odd) reads the input
#   shifted by s (0 or +1) through tap k of the spatially-flipped 3x3 kernel.
_SEL = np.zeros((2, 2, K), np.float32)
_SEL[0, 0, 1] = 1.0   # even outputs: shift 0, flipped-tap 1
_SEL[1, 0, 0] = 1.0   # odd  outputs: shift 0, flipped-tap 0
_SEL[1, 1, 2] = 1.0   # odd  outputs: shift 1, flipped-tap 2


def _deconv_kernel(x_ref, w_ref, b_ref, o_ref):
    """One (batch, spatial-tile) step: a single dense matmul + bias.

    x_ref : (1, 4*Cin, tile_M)   shifted-input stack, channels x spatial
    w_ref : (4*Cout, 4*Cin)      phase-scattered flipped kernel
    b_ref : (4*Cout, 1)          bias replicated over the 4 phases (f32)
    o_ref : (1, 4*Cout, tile_M)  output phases, channels x spatial
    """
    acc = jnp.dot(w_ref[...], x_ref[0], preferred_element_type=jnp.float32)
    o_ref[0] = (acc + b_ref[...]).astype(o_ref.dtype)


def _pick_spatial_tile(m, cin4, cout4, itemsize,
                       vmem_budget=12 * 1024 * 1024, max_tile=8192):
    """Largest 128-multiple spatial tile whose double-buffered input+output
    blocks (plus the resident weight) stay under a conservative VMEM budget."""
    w_bytes = cout4 * cin4 * itemsize + cout4 * 4
    per_col = 2 * (cin4 + cout4) * itemsize          # double-buffered x + out
    budget = max(vmem_budget - 2 * w_bytes, per_col * 128)
    cap = max(128, (budget // per_col) // 128 * 128)
    m_up = ((m + 127) // 128) * 128                  # lane-dense rounding
    tile = max(128, min(max_tile, cap, m_up))
    return (tile // 128) * 128


@jax.jit
def transition_up(x_nchw, weight, bias):
    """ConvTranspose2d(Cin, Cout, 3, 2, 1, 1) forward.

    x_nchw : (N, Cin, H, W)
    weight : (Cin, Cout, 3, 3)   (PyTorch ConvTranspose2d layout)
    bias   : (Cout,)
    returns: (N, Cout, 2H, 2W)
    """
    N, Cin, H, W = x_nchw.shape
    Cout = weight.shape[1]
    M = H * W
    cin4, cout4 = 4 * Cin, 4 * Cout

    # --- glue: 4 shifted copies of the input (shift 0/+1 in h and w, zero
    #     padded at the far edge), stacked on channels, NCHW-native layout ---
    xpad = jnp.pad(x_nchw, ((0, 0), (0, 0), (0, 1), (0, 1)))
    x_shift = jnp.concatenate(
        [xpad[:, :, sh:sh + H, sw:sw + W] for sh in range(2) for sw in range(2)],
        axis=1,
    ).reshape(N, cin4, M)

    # --- glue: scatter the 9 taps of the flipped kernel into (4*Cout, 4*Cin) ---
    sel = jnp.asarray(_SEL, weight.dtype)
    wf = jnp.transpose(weight[:, :, ::-1, ::-1], (2, 3, 0, 1))   # (K, K, Cin, Cout)
    # rows = (dh, dw, co) output phase+channel, cols = (sh, sw, ci) shift+channel
    w_big = jnp.einsum("hak,wbl,klic->hwcabi", sel, sel, wf).reshape(cout4, cin4)
    b_big = jnp.tile(bias, 4).reshape(cout4, 1).astype(jnp.float32)

    # --- spatial tiling: pad flattened H*W up to a tile multiple so every
    #     block is full-extent and lane-dense (no masked partial stores) ---
    tile_m = _pick_spatial_tile(M, cin4, cout4, x_nchw.dtype.itemsize)
    Mp = ((M + tile_m - 1) // tile_m) * tile_m
    if Mp != M:
        x_shift = jnp.pad(x_shift, ((0, 0), (0, 0), (0, Mp - M)))

    cost = pl.CostEstimate(
        flops=2 * N * cout4 * cin4 * Mp,
        transcendentals=0,
        bytes_accessed=(N * (cin4 + cout4) * Mp + cout4 * cin4 + cout4)
        * x_nchw.dtype.itemsize,
    )

    out_ph = pl.pallas_call(
        _deconv_kernel,
        out_shape=jax.ShapeDtypeStruct((N, cout4, Mp), x_nchw.dtype),
        grid=(N, Mp // tile_m),
        in_specs=[
            pl.BlockSpec((1, cin4, tile_m), lambda n, j: (n, 0, j)),
            pl.BlockSpec((cout4, cin4), lambda n, j: (0, 0)),
            pl.BlockSpec((cout4, 1), lambda n, j: (0, 0)),
        ],
        out_specs=pl.BlockSpec((1, cout4, tile_m), lambda n, j: (n, 0, j)),
        compiler_params=pltpu.CompilerParams(
            dimension_semantics=("parallel", "parallel")
        ),
        cost_estimate=cost,
    )(x_shift, w_big, b_big)

    # --- glue: depth-to-space (phase interleave) back to NCHW ---
    out = out_ph[:, :, :M].reshape(N, 2, 2, Cout, H, W)   # (n, dh, dw, co, a, b)
    out = jnp.transpose(out, (0, 3, 4, 1, 5, 2))          # (n, co, a, dh, b, dw)
    return out.reshape(N, Cout, S * H, S * W)


def _reference(x_nchw, weight, bias):
    """Independent JAX reference: transposed conv via input-dilated correlation."""
    wf = jnp.transpose(weight[:, :, ::-1, ::-1], (1, 0, 2, 3))   # OIHW, flipped
    pad = (K - 1 - P, K - 1 - P + OP)                            # (1, 2)
    out = lax.conv_general_dilated(
        x_nchw, wf, window_strides=(1, 1), padding=(pad, pad),
        lhs_dilation=(S, S), dimension_numbers=("NCHW", "OIHW", "NCHW"),
    )
    return out + bias[None, :, None, None]


if __name__ == "__main__":
    key = jax.random.PRNGKey(0)
    k_x, k_w = jax.random.split(key)

    N, Cin, Cout, H, W = 2, 4, 8, 16, 16

    # Deterministic init mirroring the module: kaiming_uniform_ on the
    # ConvTranspose2d weight (fan_in = Cout * K * K), zero bias.
    fan_in = Cout * K * K
    bound = float(np.sqrt(6.0 / fan_in))
    weight = jax.random.uniform(
        k_w, (Cin, Cout, K, K), jnp.float32, minval=-bound, maxval=bound
    )
    bias = jnp.zeros((Cout,), jnp.float32)

    x = jax.random.normal(k_x, (N, Cin, H, W), jnp.float32)

    out = jax.block_until_ready(transition_up(x, weight, bias))
    assert out.shape == (N, Cout, S * H, S * W), out.shape

    ref = jax.block_until_ready(_reference(x, weight, bias))
    np.testing.assert_allclose(np.asarray(out), np.asarray(ref), rtol=1e-5, atol=1e-5)

    print("KERNEL_OK")
</pallas_src>

<mosaic_0001>
module attributes {stable_mosaic.version = 11 : i64} {
  func.func @_deconv_kernel(%arg0: i32, %arg1: i32, %arg2: memref<1x16x256xf32, #tpu.memory_space<vmem>>, %arg3: memref<32x16xf32, #tpu.memory_space<vmem>>, %arg4: memref<32x1xf32, #tpu.memory_space<vmem>>, %arg5: memref<1x32x256xf32, #tpu.memory_space<vmem>>) attributes {dimension_semantics = [#tpu.dimension_semantics<parallel>, #tpu.dimension_semantics<parallel>], iteration_bounds = array<i64: 2, 1>, scalar_prefetch = 0 : i64, scratch_operands = 0 : i64, tpu.core_type = #tpu.core_type<tc>, window_params = [{transform_indices = @transform_0, window_bounds = array<i64: 1, 16, 256>}, {pipeline_mode = #tpu.pipeline_mode<synchronous>, transform_indices = @transform_1, window_bounds = array<i64: 32, 16>}, {pipeline_mode = #tpu.pipeline_mode<synchronous>, transform_indices = @transform_2, window_bounds = array<i64: 32, 1>}, {transform_indices = @transform_3, window_bounds = array<i64: 1, 32, 256>}]} {
    %c0 = arith.constant 0 : index
    %c0_0 = arith.constant 0 : index
    %0 = vector.load %arg3[%c0, %c0_0] : memref<32x16xf32, #tpu.memory_space<vmem>>, vector<32x16xf32>
    %c0_1 = arith.constant 0 : index
    %c0_2 = arith.constant 0 : index
    %c0_3 = arith.constant 0 : index
    %1 = vector.load %arg2[%c0_1, %c0_2, %c0_3] : memref<1x16x256xf32, #tpu.memory_space<vmem>>, vector<1x16x256xf32>
    %2 = vector.shape_cast %1 : vector<1x16x256xf32> to vector<16x256xf32>
    %cst = arith.constant dense<0.000000e+00> : vector<32x256xf32>
    %3 = tpu.matmul %0, %2, %cst {dimension_numbers = #tpu.dot_dimension_numbers<[1], [0], [0], [1], [0, 0, 1, 1], [], []>} : vector<32x16xf32>, vector<16x256xf32>, vector<32x256xf32> -> vector<32x256xf32>
    %c0_4 = arith.constant 0 : index
    %c0_5 = arith.constant 0 : index
    %4 = vector.load %arg4[%c0_4, %c0_5] : memref<32x1xf32, #tpu.memory_space<vmem>>, vector<32x1xf32>
    %5 = vector.broadcast %4 : vector<32x1xf32> to vector<32x256xf32>
    %6 = arith.addf %3, %5 : vector<32x256xf32>
    %c0_6 = arith.constant 0 : index
    %c0_7 = arith.constant 0 : index
    %c0_8 = arith.constant 0 : index
    %7 = vector.load %arg5[%c0_6, %c0_7, %c0_8] : memref<1x32x256xf32, #tpu.memory_space<vmem>>, vector<1x32x256xf32>
    %8 = vector.shape_cast %7 : vector<1x32x256xf32> to vector<32x256xf32>
    %9 = vector.shape_cast %6 : vector<32x256xf32> to vector<1x32x256xf32>
    tpu.vector_store %arg5[%c0_6, %c0_7, %c0_8], %9 {strides = array<i32>} : memref<1x32x256xf32, #tpu.memory_space<vmem>>, vector<1x32x256xf32>,
    return
  }
  func.func @transform_0(%arg0: i32, %arg1: i32) -> (i32, i32, i32) {
    %c0_i32 = arith.constant 0 : i32
    %c0_i32_0 = arith.constant 0 : i32
    return %arg0, %c0_i32, %arg1 : i32, i32, i32
  }
  func.func @transform_1(%arg0: i32, %arg1: i32) -> (i32, i32) {
    %c0_i32 = arith.constant 0 : i32
    %c0_i32_0 = arith.constant 0 : i32
    %c0_i32_1 = arith.constant 0 : i32
    return %c0_i32, %c0_i32_0 : i32, i32
  }
  func.func @transform_2(%arg0: i32, %arg1: i32) -> (i32, i32) {
    %c0_i32 = arith.constant 0 : i32
    %c0_i32_0 = arith.constant 0 : i32
    %c0_i32_1 = arith.constant 0 : i32
    return %c0_i32, %c0_i32_0 : i32, i32
  }
  func.func @transform_3(%arg0: i32, %arg1: i32) -> (i32, i32, i32) {
    %c0_i32 = arith.constant 0 : i32
    %c0_i32_0 = arith.constant 0 : i32
    return %arg0, %c0_i32, %arg1 : i32, i32, i32
  }
}

</mosaic_0001>

<bundles_post_ra>
// kernel: tile.8
= control target key start
LH: loop header
LB: loop body
LE: loop exit
PB: predicated region body
PF: predicated region fallthrough
CT: control target
= control target key end

     0   :  { %s22_s0 = inlined_call_operand.vmem [shape: f32[8], index: 0, kind: input, shape index: {}]   ;;  %s23_s1 = inlined_call_operand.vmem [shape: f32[4,8], index: 1, kind: output, shape index: {}]  }
   0x1   :  { %v4_v0 = vld [vmem:[%s22_s0] ss:$0 sm:$0xff] }
   0x2   :  { %5 = vst [vmem:[%s23_s1] sm:$0xf] %v4_v0 }

// kernel: tile.0
= control target key start
LH: loop header
LB: loop body
LE: loop exit
PB: predicated region body
PF: predicated region fallthrough
CT: control target
= control target key end

     0   :  { %s66_s8 = smov 125   ;;  %vm7_vm0 = vcmask 7168   ;;  %s67_s11 = smov 126   ;;  %s117_s0 = inlined_call_operand.vmem [shape: f32[4,8], index: 0, kind: input, shape index: {}]   ;;  %s118_s1 = inlined_call_operand.vmem [shape: f32[32,1], index: 1, kind: output, shape index: {}]  }
   0x1   :  { %v4_v0 = vld [vmem:[%s117_s0] sm:$0xf]  ;;  %s65_s0 = smov 127   ;;  %s68_s12 = smov 124  }
   0x2   :  { %5 = vst [vmem:[#allocation0] sm:$0xf] %v4_v0  ;;  %s69_s13 = smov 123   ;;  %s70_s14 = smov 122  }
   0x3   :  { %s71_s15 = smov 121  }
   0x9   :  { %v9_v1 = vld [vmem:[#allocation0] sm:$0xf]  }
   0xa   :  { %v21_v2 = vld [vmem:[#allocation0] sm:$0xf]   ;;  %10 = vrot.lane.b32.xlu0 %v9_v1, %s65_s0 }
   0xb   :  { %22 = vrot.lane.b32.xlu1 %v21_v2, %s66_s8  ;;  %v15_v3 = vld [vmem:[#allocation0] sm:$0xf]  }
   0xc   :  { %v27_v4 = vld [vmem:[#allocation0] sm:$0xf]  }
   0xd   :  { %v6_v5 = vld [vmem:[#allocation0] sm:$0xf]  }
   0xe   :  { %8 = vst.msk [vmem:[%s118_s1] ss:$8 sm:$0xf] %vm7_vm0, %v6_v5   ;;  %16 = vrot.lane.b32.xlu0 %v15_v3, %s67_s11  ;;  %v33_v6 = vld [vmem:[#allocation0] sm:$0xf]  }
   0xf   :  { %28 = vrot.lane.b32.xlu1 %v27_v4, %s68_s12  ;;  %v39_v7 = vld [vmem:[#allocation0] sm:$0xf]  }
  0x10   :  { %v45_v8 = vld [vmem:[#allocation0] sm:$0xf]  }
  0x12   :  { %34 = vrot.lane.b32.xlu0 %v33_v6, %s69_s13 }
  0x13   :  { %40 = vrot.lane.b32.xlu1 %v39_v7, %s70_s14 }
  0x16   :  { %46 = vrot.lane.b32.xlu0 %v45_v8, %s71_s15 }
  0x7c   :  { %v11_v9 = vpop.permute.xlu0 %10  }
  0x7d   :  { %v23_v10 = vpop.permute.xlu1 %22   ;;  %51 = vst.msk [vmem:[%s118_s1 + $0x1] ss:$8 sm:$0xf] %vm7_vm0, %v11_v9  }
  0x7e   :  { %53 = vst.msk [vmem:[%s118_s1 + $0x3] ss:$8 sm:$0xf] %vm7_vm0, %v23_v10  }
  0x80   :  { %v17_v11 = vpop.permute.xlu0 %16  }
  0x81   :  { %v29_v12 = vpop.permute.xlu1 %28   ;;  %52 = vst.msk [vmem:[%s118_s1 + $0x2] ss:$8 sm:$0xf] %vm7_vm0, %v17_v11  }
  0x82   :  { %54 = vst.msk [vmem:[%s118_s1 + $0x4] ss:$8 sm:$0xf] %vm7_vm0, %v29_v12  }
  0x84   :  { %v35_v13 = vpop.permute.xlu0 %34  }
  0x85   :  { %v41_v14 = vpop.permute.xlu1 %40   ;;  %55 = vst.msk [vmem:[%s118_s1 + $0x5] ss:$8 sm:$0xf] %vm7_vm0, %v35_v13  }
  0x86   :  { %56 = vst.msk [vmem:[%s118_s1 + $0x6] ss:$8 sm:$0xf] %vm7_vm0, %v41_v14  }
  0x88   :  { %v47_v15 = vpop.permute.xlu0 %46  }
  0x89   :  { %57 = vst.msk [vmem:[%s118_s1 + $0x7] ss:$8 sm:$0xf] %vm7_vm0, %v47_v15  }

// kernel: transition_up.1
= control target key start
LH: loop header
LB: loop body
LE: loop exit
PB: predicated region body
PF: predicated region fallthrough
CT: control target
= control target key end

     0   :  { %s536_s12 = smov 0   ;;  %s538_s13 = smov 0   ;;  %s597_s0 = inlined_call_operand.vmem [shape: f32[2,16,256], index: 0, kind: input, shape index: {}]   ;;  %s598_s1 = inlined_call_operand.vmem [shape: f32[32,16], index: 1, kind: input, shape index: {}]   ;;  %s599_s2 = inlined_call_operand.vmem [shape: f32[32,1], index: 2, kind: input, shape index: {}]   ;;  %s600_s3 = inlined_call_operand.vmem [shape: f32[2,32,256], index: 3, kind: output, shape index: {}]  }
   0x1   :  { %s540_s14 = smov 0  }
   0x2 LB: > { %s25_s15 = sadd.s32 1, %s508_s13  ;;  %p443_p0 = scmp.ge.s32.totalorder %s512_s14, 1  ;;  %s512_s14 = sphi %s540_s14, %s13_s14   ;;  %s508_s13 = sphi %s538_s13, %s602_s13   ;;  %s504_s12 = sphi %s536_s12, %s601_s12  }
   0x3   : > { %p27_p1 = scmp.ge.s32.totalorder %s25_s15, 2  ;;  %p158_p2 = scmp.lt.s32.totalorder %s512_s14, 3 }
   0x5   : > { %s604_s15 = smov (%p27_p1, %s25_s15), 0  ;;  %p159_p3 = pnand %p443_p0, %p158_p2 }
   0x6   : > { %p191_p4 = scmp.lt.s32.totalorder (!%p159_p3), %s504_s12, 1  ;;  %v514_v0 = vmov (!%p159_p3), 0.0   ;;  %v220_v1 = vld [vmem:[%s599_s2 + $0x10] sm:$0xff] (!%p159_p3)  ;;  %v218_v2 = vld [vmem:[%s599_s2] sm:$0xff] (!%p159_p3)  ;;  %v515_v3 = vmov (!%p159_p3), 0   ;;  %v221_v4 = vld [vmem:[%s599_s2 + $0x18] sm:$0xff] (!%p159_p3) }
   0x7   : > { %162 = sbr.rel (%p159_p3) target bundleno = 244 (0xf4), region = 32  ;;  %319 = vmatprep.mubr.f32.mxu0 (!%p159_p3), %v514_v0  ;;  %331 = vmatprep.mubr.f32.mxu1 (!%p159_p3), %v514_v0  ;;  %v219_v5 = vld [vmem:[%s599_s2 + $0x8] sm:$0xff] (!%p159_p3)  ;;  %v210_v12 = vld [vmem:[%s598_s1] sm:$0xff] (!%p159_p3)  ;;  %vm242_vm0 = vcmask (!%p159_p3), 130048   ;;  %v212_v13 = vld [vmem:[%s598_s1 + $0x10] sm:$0xff] (!%p159_p3) }
   0x8   : > { %489 = vset.pattern.permute.xlu1 (!%p159_p3), %v515_v3  ;;  %488 = vset.pattern.permute.xlu0 (!%p159_p3), %v515_v3  ;;  %v211_v14 = vld [vmem:[%s598_s1 + $0x8] sm:$0xff] (!%p159_p3)  ;;  %v213_v15 = vld [vmem:[%s598_s1 + $0x18] sm:$0xff] (!%p159_p3) }
   0x9   : > { %234 = vperm.xlu1 (!%p159_p3), %489, %v220_v1   ;;  %224 = vperm.xlu0 (!%p159_p3), %488, %v218_v2  }
   0xd   : > { %239 = vperm.xlu1 (!%p159_p3), %489, %v221_v4   ;;  %229 = vperm.xlu0 (!%p159_p3), %488, %v219_v5  }
   0xe   : > { %s606_s12 = smov (!%p191_p4, %s504_s12), 1 }
   0xf   : > { %s454_s20 = sshll.u32 %s606_s12, 5  ;;  %s455_s9 = sshll.u32 %s606_s12, 6 }
  0x10   : > { %s198_s27 = scalar_lea.vmem %s597_s0, %s454_s20  ;;  %s208_s16 = scalar_lea.vmem %s600_s3, %s455_s9 }
  0x11   : > { %v215_v6 = vld [vmem:[%s198_s27 + $0x8] sm:$0xff]  ;;  %v217_v7 = vld [vmem:[%s198_s27 + $0x18] sm:$0xff]  ;;  %v214_v8 = vld [vmem:[%s198_s27] sm:$0xff] }
  0x12   : > { %v456_v9 = vpack.c.bf16 %v217_v7, %v215_v6  ;;  %v216_v10 = vld [vmem:[%s198_s27 + $0x10] sm:$0xff] }
  0x13   : > { %v458_v11 = vpack.c.bf16 %v216_v10, %v214_v8 }
  0x14   : > { %457 = vmatprep.subr.bf16.mxu0 %v456_v9  ;;  %460 = vmatprep.subr.bf16.mxu1 %v456_v9 }
  0x15   : > { %459 = vmatpush1.bf16.msra.mxu0 %v458_v11  ;;  %461 = vmatpush1.bf16.msra.mxu1 %v458_v11 }
  0x18   : > { %448 = vmatmul.mubr.msk.f32.vlgmr.msra.gmra.mrb[0].mxu0 %vm242_vm0, %v210_v12  ;;  %450 = vmatmul.mubr.msk.f32.vlgmr.msra.gmra.mrb[0].mxu1 %vm242_vm0, %v212_v13 }
  0x19   : > { %325 = vmatprep.mubr.f32.mxu0 %v514_v0  ;;  %337 = vmatprep.mubr.f32.mxu1 %v514_v0 }
  0x1c   : > { %449 = vmatmul.mubr.msk.f32.gmra.mrb[2].mxu0 %vm242_vm0, %v211_v14  ;;  %451 = vmatmul.mubr.msk.f32.gmra.mrb[2].mxu1 %vm242_vm0, %v213_v15 }
  0x88   : > { %v235_v16 = vpop.permute.xlu1 %234  ;;  %v225_v17 = vpop.permute.xlu0 %224 }
  0x8c   : > { %v240_v26 = vpop.permute.xlu1 %239  ;;  %v230_v27 = vpop.permute.xlu0 %229 }
  0xeb   : > { %v321_v18 = vpop.f32.mrb[0].mxu0  ;;  %v333_v19 = vpop.f32.mrb[0].mxu1 }
  0xec   : > { %v322_v20 = vadd.f32 %v321_v18, %v225_v17  ;;  %v334_v21 = vadd.f32 %v333_v19, %v235_v16  ;;  %v323_v22 = vpop.f32.mrb[1].mxu0  ;;  %v335_v23 = vpop.f32.mrb[1].mxu1 }
  0xed   : > { %v324_v24 = vadd.f32 %v323_v22, %v225_v17  ;;  %v336_v25 = vadd.f32 %v335_v23, %v235_v16 }
  0xee   : > { %344 = vst [vmem:[%s208_s16] sm:$0xff] %v322_v20  ;;  %348 = vst [vmem:[%s208_s16 + $0x20] sm:$0xff] %v334_v21 }
  0xef   : > { %345 = vst [vmem:[%s208_s16 + $0x8] sm:$0xff] %v324_v24  ;;  %349 = vst [vmem:[%s208_s16 + $0x28] sm:$0xff] %v336_v25  ;;  %v327_v28 = vpop.f32.mrb[2].mxu0  ;;  %v339_v29 = vpop.f32.mrb[2].mxu1 }
  0xf0   : > { %v328_v30 = vadd.f32 %v327_v28, %v230_v27  ;;  %v340_v31 = vadd.f32 %v339_v29, %v240_v26  ;;  %v329_v32 = vpop.f32.mrb[3].mxu0  ;;  %v341_v33 = vpop.f32.mrb[3].mxu1 }
  0xf1   : > { %v330_v34 = vadd.f32 %v329_v32, %v230_v27  ;;  %v342_v35 = vadd.f32 %v341_v33, %v240_v26 }
  0xf2   : > { %346 = vst [vmem:[%s208_s16 + $0x10] sm:$0xff] %v328_v30  ;;  %350 = vst [vmem:[%s208_s16 + $0x30] sm:$0xff] %v340_v31 }
  0xf3   : > { %347 = vst [vmem:[%s208_s16 + $0x18] sm:$0xff] %v330_v34  ;;  %351 = vst [vmem:[%s208_s16 + $0x38] sm:$0xff] %v342_v35 }
  0xf4 PF: > { %s13_s14 = sadd.s32 1, %s512_s14   ;;  %s601_s12 = smov %s508_s13 }
  0xf5   : > { %p10_p5 = scmp.ge.s32.totalorder %s13_s14, 4   ;;  %s602_s13 = smov %s604_s15 }
  0xf7   :  { %12 = sbr.rel (!%p10_p5) target bundleno = 2 (0x2), region = 62 }

</bundles_post_ra>
